<compile_context>
chip_gen: v6e
topology: v6e:2x2x1
jax: 0.10.0
libtpu: 0.0.40
codegen_flags: <defaults>
</compile_context>

<pallas_src>
import functools

import jax
import jax.numpy as jnp
from jax import lax
from jax.experimental import pallas as pl
from jax.experimental.pallas import tpu as pltpu

LANES = 128
SUBLANES = 8


def _round_up(x, n):
    return (x + n - 1) // n * n


def _default_block_rows():
    """Pick the block height by TPU generation so 2 inputs x 2 pipeline buffers
    fit the default scoped VMEM (v5-class: 16 MiB -> 4096 rows = 8 MiB total;
    v6e/v7x: 32 MiB -> 8192 rows = 16 MiB total)."""
    try:
        kind = jax.devices()[0].device_kind.lower()
    except Exception:
        return 4096
    if any(s in kind for s in ("v6", "v7", "7x")):
        return 8192
    return 4096


def _focal_elementwise(p, t, *, gamma, hard_labels):
    """Plain-JAX focal loss per element (used for the <128-element ragged tail
    and as the reference)."""
    p = p.astype(jnp.float32)
    t = t.astype(jnp.float32)
    if hard_labels:
        pt = t * p + (1.0 - t) * (1.0 - p)
        bce = -jnp.maximum(jnp.log(pt), -100.0)
    else:
        bce = -(t * jnp.maximum(jnp.log(p), -100.0)
                + (1.0 - t) * jnp.maximum(jnp.log(1.0 - p), -100.0))
        pt = jnp.exp(-bce)
    return (1.0 - pt) ** gamma * bce


def _focal_loss_kernel(p_ref, t_ref, out_ref, *, gamma, rows, block_rows,
                       hard_labels):
    """One grid step: focal loss on a (block_rows, 128) tile, reduced to a single
    (8, 128) per-lane partial sum (vector adds only; the final cross-lane
    reduction and mean happen once in the wrapper)."""
    p = p_ref[...].astype(jnp.float32)
    t = t_ref[...].astype(jnp.float32)

    if rows % block_rows != 0:
        # The last block over-hangs the array; the over-hang rows hold garbage
        # that MUST be neutralized BEFORE the logs (garbage can be <=0 / NaN).
        # (p=1, t=1) contributes exactly zero under the clamped-log BCE.
        row0 = pl.program_id(0) * block_rows
        row_ids = lax.broadcasted_iota(jnp.int32, (block_rows, LANES), 0)
        valid = row_ids < (rows - row0)
        p = jnp.where(valid, p, 1.0)
        t = jnp.where(valid, t, 1.0)

    if hard_labels:
        # t in {0,1}: 1 transcendental / element (keeps the single EUP slot off
        # the critical path at v7x HBM bandwidth).
        pt = t * p + (1.0 - t) * (1.0 - p)
        bce = -jnp.maximum(jnp.log(pt), -100.0)
    else:
        # General (soft-label) path: exact F.binary_cross_entropy semantics
        # (each log term clamped at -100).
        log_p = jnp.maximum(jnp.log(p), -100.0)
        log_1mp = jnp.maximum(jnp.log(1.0 - p), -100.0)
        bce = -(t * log_p + (1.0 - t) * log_1mp)
        pt = jnp.exp(-bce)

    # gamma is a Python int -> integer_pow -> repeated VPU multiplies.
    focal = (1.0 - pt) ** gamma * bce

    # (block_rows, 128) -> (block_rows//8, 8, 128); summing the leading axis is
    # a tree of whole-vreg VPU adds (no per-step XLU work, no carried scalar).
    partial = jnp.sum(focal.reshape(-1, SUBLANES, LANES), axis=0)
    out_ref[...] = partial[None, :, :]


def focal_loss(inputs, targets, *, gamma=2, alpha=1.0, hard_labels=False,
               block_rows=None):
    """FocalLoss(gamma, alpha, logits=False, reduction='mean') forward.

    inputs: probabilities in (0, 1), any shape (e.g. (B, C, H, W)).
    targets: same shape. Caller may pass bf16 targets (lossless for {0,1}
    labels) and/or bf16 inputs to cut HBM traffic; the kernel upcasts to f32.
    hard_labels=True enables the 1-transcendental fast path (exact only for
    targets in {0, 1}).
    """
    # TODO(synk): logits=True and reduction='none' variants of the module are
    # not implemented (module defaults are logits=False, reduction='mean').
    assert inputs.shape == targets.shape
    assert isinstance(gamma, int), "gamma must be an integer (pow -> multiplies)"

    total = inputs.size
    p_flat = inputs.reshape(-1)   # row-major flatten: free bitcast, no copy
    t_flat = targets.reshape(-1)

    rows = total // LANES          # fully-populated lane rows -> kernel bulk
    tail = total - rows * LANES    # <128 ragged elements -> plain JAX

    loss_sum = jnp.float32(0.0)

    if rows > 0:
        if block_rows is None:
            block_rows = _default_block_rows()
        # Multiple of 8 sublanes; capped so there are >=2 blocks when possible
        # (v7x megacore: the "parallel" grid axis feeds both TensorCores).
        br = max(SUBLANES,
                 min(_round_up(block_rows, SUBLANES),
                     _round_up(pl.cdiv(rows, 2), SUBLANES)))
        num_blocks = pl.cdiv(rows, br)

        if tail:
            p2d = p_flat[: rows * LANES].reshape(rows, LANES)
            t2d = t_flat[: rows * LANES].reshape(rows, LANES)
        else:
            p2d = p_flat.reshape(rows, LANES)   # no pad, no copy
            t2d = t_flat.reshape(rows, LANES)

        kernel = functools.partial(_focal_loss_kernel, gamma=gamma, rows=rows,
                                   block_rows=br, hard_labels=hard_labels)
        partials = pl.pallas_call(
            kernel,
            out_shape=jax.ShapeDtypeStruct((num_blocks, SUBLANES, LANES),
                                           jnp.float32),
            grid_spec=pltpu.PrefetchScalarGridSpec(
                num_scalar_prefetch=0,
                grid=(num_blocks,),
                in_specs=[
                    pl.BlockSpec((br, LANES), lambda i: (i, 0)),
                    pl.BlockSpec((br, LANES), lambda i: (i, 0)),
                ],
                out_specs=pl.BlockSpec((1, SUBLANES, LANES),
                                       lambda i: (i, 0, 0)),
            ),
            compiler_params=pltpu.CompilerParams(
                # No carried state -> fully parallel grid (shards across TCs).
                dimension_semantics=("parallel",),
            ),
        )(p2d, t2d)
        loss_sum = loss_sum + jnp.sum(partials)

    if tail:
        loss_sum = loss_sum + jnp.sum(
            _focal_elementwise(p_flat[rows * LANES:], t_flat[rows * LANES:],
                               gamma=gamma, hard_labels=hard_labels))

    return jnp.float32(alpha) * loss_sum / jnp.float32(total)


def focal_loss_ref(inputs, targets, *, gamma=2, alpha=1.0):
    return jnp.mean(alpha * _focal_elementwise(inputs, targets, gamma=gamma,
                                               hard_labels=False))


if __name__ == "__main__":
    key = jax.random.PRNGKey(0)
    k1, k2, k3, k4 = jax.random.split(key, 4)

    # Shape implied by the module's typical use: NCHW probability maps.
    B, C, H, W = 2, 4, 16, 16
    inputs = jax.nn.sigmoid(jax.random.normal(k1, (B, C, H, W), jnp.float32))
    targets = (jax.random.uniform(k2, (B, C, H, W)) > 0.5).astype(jnp.float32)

    ref = focal_loss_ref(inputs, targets)

    # 1) General (soft-label-capable) path, aligned shape, no pad/copy.
    loss = jax.block_until_ready(focal_loss(inputs, targets))
    assert jnp.allclose(loss, ref, rtol=1e-5, atol=1e-6), (loss, ref)

    # 2) Hard-label fast path (targets are {0,1} here).
    loss_hard = jax.block_until_ready(focal_loss(inputs, targets,
                                                 hard_labels=True))
    assert jnp.allclose(loss_hard, ref, rtol=1e-5, atol=1e-6), (loss_hard, ref)

    # 3) Ragged shape: exercises the partial-last-block in-kernel masking and
    #    the <128-element plain-JAX tail (no whole-tensor pad).
    inputs2 = jax.nn.sigmoid(jax.random.normal(k3, (2, 3, 17, 19), jnp.float32))
    targets2 = (jax.random.uniform(k4, (2, 3, 17, 19)) > 0.5).astype(jnp.float32)
    loss2 = jax.block_until_ready(focal_loss(inputs2, targets2))
    ref2 = focal_loss_ref(inputs2, targets2)
    assert jnp.allclose(loss2, ref2, rtol=1e-5, atol=1e-6), (loss2, ref2)

    # 4) bf16 targets (lossless for {0,1} labels) -> fewer HBM bytes, same result.
    loss_bf16 = jax.block_until_ready(
        focal_loss(inputs, targets.astype(jnp.bfloat16)))
    assert jnp.allclose(loss_bf16, ref, rtol=1e-5, atol=1e-6), (loss_bf16, ref)

    print("KERNEL_OK")
</pallas_src>

<mosaic_0001>
module attributes {stable_mosaic.version = 11 : i64} {
  func.func @_focal_loss_kernel(%arg0: i32, %arg1: memref<8x128xf32, #tpu.memory_space<vmem>>, %arg2: memref<8x128xf32, #tpu.memory_space<vmem>>, %arg3: memref<1x8x128xf32, #tpu.memory_space<vmem>>) attributes {dimension_semantics = [#tpu.dimension_semantics<parallel>], iteration_bounds = array<i64: 2>, scalar_prefetch = 0 : i64, scratch_operands = 0 : i64, tpu.core_type = #tpu.core_type<tc>, window_params = [{transform_indices = @transform_0, window_bounds = array<i64: 8, 128>}, {transform_indices = @transform_1, window_bounds = array<i64: 8, 128>}, {transform_indices = @transform_2, window_bounds = array<i64: 1, 8, 128>}]} {
    %c0 = arith.constant 0 : index
    %c0_0 = arith.constant 0 : index
    %0 = vector.load %arg1[%c0, %c0_0] : memref<8x128xf32, #tpu.memory_space<vmem>>, vector<8x128xf32>
    %c0_1 = arith.constant 0 : index
    %c0_2 = arith.constant 0 : index
    %1 = vector.load %arg2[%c0_1, %c0_2] : memref<8x128xf32, #tpu.memory_space<vmem>>, vector<8x128xf32>
    %2 = math.log %0 : vector<8x128xf32>
    %cst = arith.constant -1.000000e+02 : f32
    %3 = vector.broadcast %cst : f32 to vector<8x128xf32>
    %4 = arith.maximumf %2, %3 : vector<8x128xf32>
    %cst_3 = arith.constant 1.000000e+00 : f32
    %5 = vector.broadcast %cst_3 : f32 to vector<8x128xf32>
    %6 = arith.subf %5, %0 : vector<8x128xf32>
    %7 = math.log %6 : vector<8x128xf32>
    %cst_4 = arith.constant -1.000000e+02 : f32
    %8 = vector.broadcast %cst_4 : f32 to vector<8x128xf32>
    %9 = arith.maximumf %7, %8 : vector<8x128xf32>
    %10 = arith.mulf %1, %4 : vector<8x128xf32>
    %cst_5 = arith.constant 1.000000e+00 : f32
    %11 = vector.broadcast %cst_5 : f32 to vector<8x128xf32>
    %12 = arith.subf %11, %1 : vector<8x128xf32>
    %13 = arith.mulf %12, %9 : vector<8x128xf32>
    %14 = arith.addf %10, %13 : vector<8x128xf32>
    %cst_6 = arith.constant 0.000000e+00 : f32
    %15 = vector.broadcast %cst_6 : f32 to vector<8x128xf32>
    %16 = arith.subf %15, %14 : vector<8x128xf32>
    %cst_7 = arith.constant 0.000000e+00 : f32
    %17 = vector.broadcast %cst_7 : f32 to vector<8x128xf32>
    %18 = arith.subf %17, %16 : vector<8x128xf32>
    %19 = math.exp %18 : vector<8x128xf32>
    %cst_8 = arith.constant 1.000000e+00 : f32
    %20 = vector.broadcast %cst_8 : f32 to vector<8x128xf32>
    %21 = arith.subf %20, %19 : vector<8x128xf32>
    %22 = arith.mulf %21, %21 : vector<8x128xf32>
    %23 = arith.mulf %22, %16 : vector<8x128xf32>
    %24 = vector.shape_cast %23 : vector<8x128xf32> to vector<1x8x128xf32>
    %cst_9 = arith.constant dense<0.000000e+00> : vector<8x128xf32>
    %25 = vector.multi_reduction <add>, %24, %cst_9 [0] : vector<1x8x128xf32> to vector<8x128xf32>
    %26 = vector.shape_cast %25 : vector<8x128xf32> to vector<1x8x128xf32>
    %c0_10 = arith.constant 0 : index
    %c0_11 = arith.constant 0 : index
    %c0_12 = arith.constant 0 : index
    %27 = vector.load %arg3[%c0_10, %c0_11, %c0_12] : memref<1x8x128xf32, #tpu.memory_space<vmem>>, vector<1x8x128xf32>
    tpu.vector_store %arg3[%c0_10, %c0_11, %c0_12], %26 {strides = array<i32>} : memref<1x8x128xf32, #tpu.memory_space<vmem>>, vector<1x8x128xf32>,
    return
  }
  func.func @transform_0(%arg0: i32) -> (i32, i32) {
    %c0_i32 = arith.constant 0 : i32
    %c0_i32_0 = arith.constant 0 : i32
    return %arg0, %c0_i32 : i32, i32
  }
  func.func @transform_1(%arg0: i32) -> (i32, i32) {
    %c0_i32 = arith.constant 0 : i32
    %c0_i32_0 = arith.constant 0 : i32
    return %arg0, %c0_i32 : i32, i32
  }
  func.func @transform_2(%arg0: i32) -> (i32, i32, i32) {
    %c0_i32 = arith.constant 0 : i32
    %c0_i32_0 = arith.constant 0 : i32
    %c0_i32_1 = arith.constant 0 : i32
    return %arg0, %c0_i32, %c0_i32_0 : i32, i32, i32
  }
}

</mosaic_0001>

<bundles_post_ra>
// kernel: tpu_custom_call.1
= control target key start
LH: loop header
LB: loop body
LE: loop exit
PB: predicated region body
PF: predicated region fallthrough
CT: control target
= control target key end

     0   :  { %7 = vsyncpa [#allocation3], 0  ;;  %s740_s0 = inlined_call_operand.hbm [shape: f32[16,128], index: 0, kind: input, shape index: {}]   ;;  %s741_s1 = inlined_call_operand.hbm [shape: f32[16,128], index: 1, kind: input, shape index: {}]   ;;  %s742_s2 = inlined_call_operand.hbm [shape: f32[2,8,128], index: 2, kind: output, shape index: {}]  }
   0x1   :  { %9 = vsyncpa [#allocation3 + $0x1], 0 }
   0x2   :  { %10 = vsyncpa [#allocation6], 0 }
   0x3   :  { %12 = vsyncpa [#allocation6 + $0x1], 0 }
   0x4   :  { %13 = vsyncpa [#allocation4], 0 }
   0x5   :  { %15 = vsyncpa [#allocation4 + $0x1], 0  ;;  %s541_s9 = smov 0   ;;  %s543_s10 = smov 0  }
   0x6   :  { %s545_s11 = smov 0   ;;  %s547_s12 = smov 0  }
   0x7 LB: > { %s562_s13 = sadd.s32 4294967295, %s521_s12   ;;  %s325_s14 = sadd.s32 4294967294, %s521_s12   ;;  %s521_s12 = sphi %s547_s12, %s761_s12   ;;  %s517_s11 = sphi %s545_s11, %s760_s11   ;;  %s513_s10 = sphi %s543_s10, %s759_s10   ;;  %s509_s9 = sphi %s541_s9, %s758_s9  }
   0x8   : > { %s566_s15 = sadd.s32 1, %s521_s12   ;;  %s28_s16 = sadd.s32 1, %s517_s11 }
   0x9   : > { %s25_s17 = ssub.s32 %s521_s12, %s566_s15  ;;  %p35_p0 = scmp.ne.s32.totalorder %s517_s11, %s513_s10 }
   0xa   : > { %p26_p1 = scmp.eq.s32.totalorder %s25_s17, 0  ;;  %p36_p2 = scmp.eq.s32.totalorder %s521_s12, 0 }
   0xb   : > { %p41_p3 = scmp.ne.s32.totalorder %s513_s10, %s509_s9  ;;  %p42_p4 = scmp.eq.s32.totalorder %s562_s13, 0 }
   0xc   : > { %s578_s18 = scalar_select %p26_p1, %s517_s11, %s28_s16  }
   0xd   : > { %p580_p5 = por %p36_p2, %p35_p0  ;;  %p584_p6 = por %p42_p4, %p41_p3 }
   0xe   : > { %p91_p7 = scmp.eq.s32.totalorder %s562_s13, 1  ;;  %p97_p8 = scmp.eq.s32.totalorder %s325_s14, 1 }
   0xf   : > { %s746_s20 = scalar_select %p584_p6, 1, 0 }
  0x10   : > { %p357_p10 = scmp.lt.s32.totalorder %s521_s12, 2  ;;  %p591_p11 = por %p91_p7, %p35_p0 }
  0x11   : > { %p595_p12 = por %p97_p8, %p41_p3  ;;  %s600_s23 = sand.u32 1, %s517_s11  }
  0x12   : > { %s747_s21 = scalar_select %p591_p11, 1, 0 }
  0x13   : > { %s748_s22 = scalar_select %p595_p12, 1, 0 }
  0x14   : > { %s329_s24 = sshll.u32 %s521_s12, 7  ;;  %s328_s25 = sshll.u32 %s600_s23, 3 }
  0x15   : > { %s609_s28 = scalar_lea.hbm %s740_s0, %s329_s24  ;;  %s121_s29 = scalar_lea.vmem [#allocation2], %s328_s25 }
  0x16   : > { %s128_s30 = sshll.u32 %s121_s29, 4  ;;  %p615_p13 = pnand %p357_p10, %p580_p5  ;;  %s619_s30 = int_to_ptr.vmem [resolvable:$true] %s128_s30 }
  0x17   : > { %s118_s4 = scalar_lea.sflag [#allocation3], %s600_s23  ;;  %s397_s5 = scalar_lea.hbm %s609_s28, 128 }
  0x18   : > { %p398_p2 = scmp.ne.s32.totalorder %s609_s28, %s397_s5  ;;  %p399_p3 = pneg %p615_p13 }
  0x19   : > { %s402_s8 = scalar_lea.hbm %s740_s0, 256  ;;  %p403_p5 = scmp.lt.s32.totalorder %s609_s28, %s740_s0 }
  0x1a   : > { %p400_p4 = pnand %p399_p3, %p398_p2  ;;  %p404_p8 = scmp.lt.s32.totalorder %s402_s8, %s397_s5 }
  0x1c   : > { %p401_p7 = pneg %p400_p4  ;;  %p405_p10 = por %p404_p8, %p403_p5 }
  0x1e   : > { %p406_p9 = pnand %p405_p10, %p401_p7 }
  0x20   : > { %409 = shalt.err (!%p406_p9)
}
  0x21   : > { %s410_s17 = scalar_lea.vmem %s619_s30, 128  ;;  %s523_s19 = smov [#allocation2]  }
  0x22   : > { %p411_p0 = scmp.ne.s32.totalorder %s619_s30, %s410_s17  ;;  %s415_s26 = sshll.u32 %s523_s19, 4  ;;  %s416_s26 = int_to_ptr.vmem [resolvable:$false] %s415_s26 }
  0x23   : > { %s417_s27 = scalar_lea.vmem %s416_s26, 256  ;;  %p418_p1 = scmp.lt.s32.totalorder %s619_s30, %s416_s26 }
  0x24   : > { %p413_p2 = pnand %p411_p0, %p399_p3  ;;  %p419_p12 = scmp.lt.s32.totalorder %s417_s27, %s410_s17 }
  0x26   : > { %p414_p4 = pneg %p413_p2  ;;  %p420_p11 = por %p419_p12, %p418_p1 }
  0x28   : > { %p421_p5 = pnand %p420_p11, %p414_p4 }
  0x2a   : > { %424 = shalt.err (!%p421_p5)
}
  0x2b   : > { %349 = dma.hbm_to_vmem [thread:$0]  (!%p615_p13), %s609_s28, 128, %s619_s30, %s118_s4  }
  0x2c   : > { %p750_p9 = scmp.lt.s32.totalorder %s521_s12, 3  ;;  %p751_p0 = scmp.ge.s32.totalorder %s521_s12, 1 }
  0x2d   : > { %s661_s7 = scalar_lea.hbm %s741_s1, %s329_s24  ;;  %s139_s8 = scalar_lea.vmem [#allocation5], %s328_s25 }
  0x2e   : > { %p652_p7 = pnand %p751_p0, %p750_p9  ;;  %s146_s14 = sshll.u32 %s139_s8, 4  ;;  %s147_s14 = int_to_ptr.vmem [resolvable:$true] %s146_s14 }
  0x2f   : > { %s136_s28 = scalar_lea.sflag [#allocation6], %s600_s23  ;;  %s425_s30 = scalar_lea.hbm %s661_s7, 128 }
  0x30   : > { %s752_s29 = scalar_select %p652_p7, 1, 0 }
  0x31   : > { %p426_p11 = scmp.ne.s32.totalorder %s661_s7, %s425_s30  ;;  %s430_s17 = scalar_lea.hbm %s741_s1, 256 }
  0x32   : > { %p431_p8 = scmp.lt.s32.totalorder %s661_s7, %s741_s1  ;;  %p432_p10 = scmp.lt.s32.totalorder %s430_s17, %s425_s30 }
  0x33   : > { %p428_p12 = pnand %p426_p11, %p399_p3 }
  0x34   : > { %p433_p2 = por %p432_p10, %p431_p8 }
  0x35   : > { %p429_p1 = pneg %p428_p12 }
  0x37   : > { %p434_p4 = pnand %p433_p2, %p429_p1 }
  0x39   : > { %437 = shalt.err (!%p434_p4)
}
  0x3a   : > { %s438_s25 = scalar_lea.vmem %s147_s14, 128  ;;  %s524_s23 = smov [#allocation5]  }
  0x3b   : > { %p439_p5 = scmp.ne.s32.totalorder %s147_s14, %s438_s25  ;;  %s443_s26 = sshll.u32 %s524_s23, 4  ;;  %s444_s26 = int_to_ptr.vmem [resolvable:$false] %s443_s26 }
  0x3c   : > { %s445_s27 = scalar_lea.vmem %s444_s26, 256  ;;  %p446_p11 = scmp.lt.s32.totalorder %s147_s14, %s444_s26 }
  0x3d   : > { %p441_p9 = pnand %p439_p5, %p399_p3  ;;  %p447_p12 = scmp.lt.s32.totalorder %s445_s27, %s438_s25 }
  0x3f   : > { %p442_p0 = pneg %p441_p9  ;;  %p448_p6 = por %p447_p12, %p446_p11 }
  0x41   : > { %p449_p7 = pnand %p448_p6, %p442_p0 }
  0x43   : > { %452 = shalt.err (!%p449_p7)
}
  0x44   : > { %352 = dma.hbm_to_vmem [thread:$0]  (!%p615_p13), %s661_s7, 128, %s147_s14, %s136_s28  }
  0x45   : > { %p753_p1 = scmp.ne.s32.totalorder %s752_s29, 0 }
  0x46   : > { %s687_s5 = sand.u32 (!%p753_p1), 1, %s513_s10   ;;  %p754_p6 = scmp.ne.s32.totalorder (!%p753_p1), %s746_s20, 0 }
  0x47   : > { %155 = sbr.rel (%p753_p1) target bundleno = 143 (0x8f), region = 28  ;;  %s690_s6 = sshll.u32 (!%p753_p1), %s687_s5, 3 }
  0x48   : > { %s158_s8 = scalar_lea.sflag (!%p753_p1), [#allocation3], %s687_s5  ;;  %s161_s30 = scalar_lea.vmem (!%p753_p1), [#allocation2], %s690_s6 }
  0x4c   : > { %496 = dma.done.wait (%p754_p6), %s158_s8, 128  }
  0x4d   : > { %498 = vsyncadd (%p754_p6), %s158_s8, 4294967168  ;;  %s167_s3 = scalar_lea.sflag [#allocation6], %s687_s5  ;;  %s170_s29 = scalar_lea.vmem [#allocation5], %s690_s6 }
  0x4e   : > { %500 = dma.done.wait (%p754_p6), %s167_s3, 128  }
  0x4f   : > { %502 = vsyncadd (%p754_p6), %s167_s3, 4294967168  ;;  %v196_v0 = vld [vmem:[%s161_s30] sm:$0xff]  ;;  %v197_v3 = vld [vmem:[%s170_s29] sm:$0xff]  ;;  %s195_s20 = scalar_lea.vmem [#allocation7], %s690_s6  ;;  %s337_s14 = sshll.u32 %s562_s13, 7 }
  0x50   : > { %391 = vlog2.f32 %v196_v0  ;;  %v201_v1 = vsub.f32 1.0, %v196_v0  ;;  %v206_v8 = vsub.f32 1.0, %v197_v3  ;;  %s232_s7 = sshll.u32 %s195_s20, 4  ;;  %s230_s16 = scalar_lea.hbm %s742_s2, %s337_s14  ;;  %s233_s7 = int_to_ptr.vmem [resolvable:$true] %s232_s7 }
  0x51   : > { %s219_s17 = scalar_lea.sflag [#allocation4], %s687_s5  ;;  %s453_s24 = scalar_lea.vmem %s233_s7, 128 }
  0x52   : > { %393 = vlog2.f32 %v201_v1  ;;  %p454_p13 = scmp.ne.s32.totalorder %s233_s7, %s453_s24  ;;  %p755_p3 = scmp.ne.s32.totalorder %s747_s21, 0 }
  0x53   : > { %s525_s19 = smov [#allocation7]  }
  0x54   : > { %p455_p7 = pnand %p454_p13, %p755_p3  ;;  %s457_s25 = sshll.u32 %s525_s19, 4  ;;  %s458_s25 = int_to_ptr.vmem [resolvable:$false] %s457_s25 }
  0x55   : > { %s459_s23 = scalar_lea.vmem %s458_s25, 256  ;;  %p460_p10 = scmp.lt.s32.totalorder %s233_s7, %s458_s25 }
  0x56   : > { %p456_p8 = pneg %p455_p7  ;;  %p461_p2 = scmp.lt.s32.totalorder %s459_s23, %s453_s24 }
  0x58   : > { %p462_p4 = por %p461_p2, %p460_p10 }
  0x5a   : > { %p463_p5 = pnand %p462_p4, %p456_p8 }
  0x5d   : > { %v392_v2 = vpop.eup %391 }
  0x5e   : > { %v199_v4 = vmul.f32 0.6931472, %v392_v2 }
  0x5f   : > { %v394_v5 = vpop.eup %393 }
  0x60   : > { %v200_v6 = vmax.f32 %v199_v4, -100.0  ;;  %v203_v7 = vmul.f32 0.6931472, %v394_v5 }
  0x62   : > { %v204_v9 = vmax.f32 %v203_v7, -100.0  ;;  %v205_v10 = vmul.f32 %v200_v6, %v197_v3 }
  0x64   : > { %v207_v11 = vmul.f32 %v206_v8, %v204_v9 }
  0x66   : > { %v208_v12 = vadd.f32 %v207_v11, %v205_v10 }
  0x68   : > { %v209_v13 = vsub.f32 0.0, %v208_v12 }
  0x6a   : > { %v210_v14 = vsub.f32 0.0, %v209_v13 }
  0x6c   : > { %v211_v15 = vmul.f32 1.442695, %v210_v14 }
  0x6e   : > { %395 = vpow2.f32 %v211_v15 }
  0x7b   : > { %v396_v16 = vpop.eup %395 }
  0x7c   : > { %v213_v17 = vsub.f32 1.0, %v396_v16 }
  0x7e   : > { %v214_v18 = vmul.f32 %v213_v17, %v213_v17 }
  0x80   : > { %v215_v19 = vmul.f32 %v214_v18, %v209_v13 }
  0x82   : > { %217 = vst [vmem:[%s195_s20] sm:$0xff] %v215_v19 }
  0x83   : > { %466 = shalt.err (!%p463_p5)
}
  0x84   : > { %s467_s13 = scalar_lea.hbm %s230_s16, 128  ;;  %s471_s5 = scalar_lea.hbm %s742_s2, 256 }
  0x85   : > { %p468_p9 = scmp.ne.s32.totalorder %s230_s16, %s467_s13  ;;  %p472_p12 = scmp.lt.s32.totalorder %s230_s16, %s742_s2 }
  0x86   : > { %p473_p1 = scmp.lt.s32.totalorder %s471_s5, %s467_s13 }
  0x87   : > { %p469_p0 = pnand %p468_p9, %p755_p3 }
  0x88   : > { %p474_p6 = por %p473_p1, %p472_p12 }
  0x89   : > { %p470_p11 = pneg %p469_p0 }
  0x8b   : > { %p475_p13 = pnand %p474_p6, %p470_p11 }
  0x8d   : > { %478 = shalt.err (!%p475_p13)
}
  0x8e   : > { %344 = dma.vmem_to_hbm [thread:$0]  (%p755_p3), %s233_s7, 128, %s230_s16, %s219_s17  }
  0x8f PF: > { %s244_s30 = sand.u32 1, %s509_s9   ;;  %p756_p7 = scmp.ne.s32.totalorder %s748_s22, 0 }
  0x90   : > { %p757_p8 = scmp.ge.s32.totalorder %s521_s12, 2  ;;  %s245_s3 = scalar_lea.sflag [#allocation4], %s244_s30 }
  0x92   : > { %p354_p10 = pnand %p757_p8, %p756_p7 }
  0x94   : > { %p355_p2 = pneg %p354_p10 }
  0x96   : > { %504 = dma.done.wait (%p355_p2), %s245_s3, 128  }
  0x97   : > { %506 = vsyncadd (%p355_p2), %s245_s3, 4294967168  ;;  %p18_p4 = scmp.ge.s32.totalorder %s566_s15, 4   ;;  %s758_s9 = smov %s513_s10 }
  0x98   : > { %s759_s10 = smov %s517_s11  ;;  %s760_s11 = smov %s578_s18 }
  0x99   : > { %s761_s12 = smov %s566_s15  ;;  %20 = sbr.rel (!%p18_p4) target bundleno = 7 (0x7), region = 86 }
  0x9e   :  { %250 = vsyncpa [#allocation3], 1 }
  0x9f   :  { %252 = vsyncpa [#allocation3 + $0x1], 1 }
  0xa0   :  { %253 = vsyncpa [#allocation6], 1 }
  0xa1   :  { %255 = vsyncpa [#allocation6 + $0x1], 1 }
  0xa2   :  { %256 = vsyncpa [#allocation4], 1 }
  0xa3   :  { %258 = vsyncpa [#allocation4 + $0x1], 1 }

</bundles_post_ra>
